<compile_context>
chip_gen: v7x
topology: tpu7x:2x2x1
jax: 0.10.0
libtpu: 0.0.40
codegen_flags: <defaults>
</compile_context>

<pallas_src>
import functools

import jax
import jax.numpy as jnp
from jax.experimental import pallas as pl
from jax.experimental.pallas import tpu as pltpu


# ---------------------------------------------------------------------------
# helpers
# ---------------------------------------------------------------------------
def _round_up(v, m):
    return ((v + m - 1) // m) * m


def _pick_tile(dim, target, align=128):
    """Largest lane-aligned tile <= target that divides round_up(dim, align).

    Guarantees the persistent weight is padded at most to the 128 alignment
    boundary (never by a whole extra tile), so no weight HBM is wasted.
    """
    padded = _round_up(dim, align)
    target = max(align, (int(target) // align) * align)
    if padded <= target:
        return padded
    for cand in range(target, align - 1, -align):
        if padded % cand == 0:
            return cand
    return align


# ---------------------------------------------------------------------------
# kernels  (weight already in (K, N) layout -> native MXU contraction)
# ---------------------------------------------------------------------------
def _kernel_1k_bias(x_ref, w_ref, b_ref, y_ref, o_ref):
    z = jnp.dot(x_ref[...], w_ref[...], preferred_element_type=jnp.float32)
    o_ref[...] = (z + b_ref[...].astype(jnp.float32)
                  + y_ref[...].astype(jnp.float32)).astype(o_ref.dtype)


def _kernel_1k_nobias(x_ref, w_ref, y_ref, o_ref):
    z = jnp.dot(x_ref[...], w_ref[...], preferred_element_type=jnp.float32)
    o_ref[...] = (z + y_ref[...].astype(jnp.float32)).astype(o_ref.dtype)


def _kernel_kred_bias(x_ref, w_ref, b_ref, y_ref, o_ref, acc_ref):
    k = pl.program_id(2)

    @pl.when(k == 0)
    def _():
        acc_ref[...] = jnp.zeros_like(acc_ref)

    acc_ref[...] += jnp.dot(x_ref[...], w_ref[...],
                            preferred_element_type=jnp.float32)

    @pl.when(k == pl.num_programs(2) - 1)
    def _():
        o_ref[...] = (acc_ref[...] + b_ref[...].astype(jnp.float32)
                      + y_ref[...].astype(jnp.float32)).astype(o_ref.dtype)


def _kernel_kred_nobias(x_ref, w_ref, y_ref, o_ref, acc_ref):
    k = pl.program_id(2)

    @pl.when(k == 0)
    def _():
        acc_ref[...] = jnp.zeros_like(acc_ref)

    acc_ref[...] += jnp.dot(x_ref[...], w_ref[...],
                            preferred_element_type=jnp.float32)

    @pl.when(k == pl.num_programs(2) - 1)
    def _():
        o_ref[...] = (acc_ref[...]
                      + y_ref[...].astype(jnp.float32)).astype(o_ref.dtype)


# ---------------------------------------------------------------------------
# jitted forward (weight/bias arrive already prepared -- never touched here)
# ---------------------------------------------------------------------------
@functools.partial(
    jax.jit,
    static_argnames=("in_features", "out_features", "tm", "tn_e", "tk_e",
                     "Np", "Kp", "compute_dtype", "has_bias"))
def _linear_add_fwd(x, y, w_kn, b_1n, *, in_features, out_features, tm, tn_e,
                    tk_e, Np, Kp, compute_dtype, has_bias):
    orig_lead = x.shape[:-1]
    x2d = x.reshape(-1, in_features)
    y2d = y.reshape(-1, out_features)
    M = x2d.shape[0]
    K, N = in_features, out_features

    out_dtype = jnp.promote_types(x.dtype, y.dtype)

    # Per-call M tiling (activations only -- cheap to pad/cast).
    tm_e = min(tm, _round_up(M, 128))
    Mp = _round_up(M, tm_e)
    kt = Kp // tk_e
    grid_m = Mp // tm_e
    grid_n = Np // tn_e

    if x2d.dtype != compute_dtype:
        x2d = x2d.astype(compute_dtype)
    if (Mp, Kp) != (M, K):
        x2d = jnp.pad(x2d, ((0, Mp - M), (0, Kp - K)))
    if (Mp, Np) != (M, N):
        y2d = jnp.pad(y2d, ((0, Mp - M), (0, Np - N)))

    ce = jnp.dtype(compute_dtype).itemsize
    ye = jnp.dtype(y2d.dtype).itemsize
    oe = jnp.dtype(out_dtype).itemsize

    # Decode-like (single M block, big weight stream) -> deepen W pipelining.
    deep_w = (grid_m == 1 and Mp <= 256
              and Kp * Np * ce >= (32 << 20)
              and grid_n * kt >= 4)
    w_buffers = 3 if deep_w else 2

    # VMEM limit from the actual buffered tile footprint (+ headroom), so it
    # stays comfortably inside v7x's 64 MiB per-TensorCore VMEM.
    footprint = (2 * (tm_e * tk_e * ce)                  # x tiles
                 + w_buffers * (tk_e * tn_e * ce)        # W tiles
                 + 2 * (tm_e * tn_e * ye)                # residual tiles
                 + 2 * (tm_e * tn_e * oe)                # output tiles
                 + (2 * 8 * tn_e * 4 if has_bias else 0)  # bias tile (padded)
                 + (tm_e * tn_e * 4 if kt > 1 else 0))   # f32 accumulator
    vmem_limit = int(min(footprint + (16 << 20), 100 << 20))

    cost = pl.CostEstimate(
        flops=2 * Mp * Np * Kp,
        transcendentals=0,
        bytes_accessed=(Mp * Kp * ce + Kp * Np * ce
                        + Mp * Np * ye + Mp * Np * oe
                        + (Np * 4 if has_bias else 0)),
    )

    compiler_params = pltpu.CompilerParams(
        dimension_semantics=(("parallel", "parallel") if kt == 1 else
                             ("parallel", "parallel", "arbitrary")),
        vmem_limit_bytes=vmem_limit,
    )

    if kt == 1:
        # Fast path: whole K in one tile -> no accumulator, no K grid axis.
        x_spec = pl.BlockSpec((tm_e, tk_e), lambda i, j: (i, 0))
        w_idx = lambda i, j: (0, j)
        b_spec = pl.BlockSpec((1, tn_e), lambda i, j: (0, j))
        yo_spec = pl.BlockSpec((tm_e, tn_e), lambda i, j: (i, j))
        grid = (grid_m, grid_n)
        scratch = []
        kernel = _kernel_1k_bias if has_bias else _kernel_1k_nobias
    else:
        x_spec = pl.BlockSpec((tm_e, tk_e), lambda i, j, k: (i, k))
        w_idx = lambda i, j, k: (k, j)
        b_spec = pl.BlockSpec((1, tn_e), lambda i, j, k: (0, j))
        yo_spec = pl.BlockSpec((tm_e, tn_e), lambda i, j, k: (i, j))
        grid = (grid_m, grid_n, kt)
        scratch = [pltpu.VMEM((tm_e, tn_e), jnp.float32)]
        kernel = _kernel_kred_bias if has_bias else _kernel_kred_nobias

    if deep_w:
        w_spec = pl.BlockSpec((tk_e, tn_e), w_idx, pipeline_mode=pl.Buffered(3))
    else:
        w_spec = pl.BlockSpec((tk_e, tn_e), w_idx)

    if has_bias:
        in_specs = [x_spec, w_spec, b_spec, yo_spec]
        inputs = (x2d, w_kn, b_1n, y2d)
        y_index = 3
    else:
        in_specs = [x_spec, w_spec, yo_spec]
        inputs = (x2d, w_kn, y2d)
        y_index = 2

    # Alias the residual into the output when dtypes match (free HBM saving).
    io_aliases = {y_index: 0} if y2d.dtype == out_dtype else {}

    out = pl.pallas_call(
        kernel,
        out_shape=jax.ShapeDtypeStruct((Mp, Np), out_dtype),
        grid_spec=pltpu.PrefetchScalarGridSpec(
            num_scalar_prefetch=0,
            grid=grid,
            in_specs=in_specs,
            out_specs=yo_spec,
            scratch_shapes=scratch),
        compiler_params=compiler_params,
        cost_estimate=cost,
        input_output_aliases=io_aliases,
    )(*inputs)

    out = out[:M, :N]
    return out.reshape(*orig_lead, out_features)


# ---------------------------------------------------------------------------
# module-like wrapper (mirrors ipex.llm.modules.LinearAdd forward semantics)
# ---------------------------------------------------------------------------
class LinearAddTPU:
    """result = x @ weight.T + bias + other   (weight in torch (out, in) layout).

    Weight/bias are prepared once at construction (transpose -> (K, N), cast to
    the MXU compute dtype, pad to aligned tile multiples) and held persistently,
    so the per-call jitted path never re-casts or re-pads the weight.
    Default compute_dtype=bf16 is mixed precision (f32 accumulation); pass
    compute_dtype=jnp.float32 for exact f32 parity with torch.
    """

    def __init__(self, weight, bias=None, *, tm=512, tn=512, tk=4096,
                 compute_dtype=jnp.bfloat16):
        weight = jnp.asarray(weight)
        N, K = weight.shape                       # torch layout: (out, in)
        self.out_features = int(N)
        self.in_features = int(K)
        self.compute_dtype = compute_dtype
        self.tm = max(128, _round_up(int(tm), 128))

        self.tn_e = _pick_tile(N, tn)
        self.tk_e = _pick_tile(K, tk)
        self.Np = _round_up(N, self.tn_e)
        self.Kp = _round_up(K, self.tk_e)

        # One-time weight preparation (amortized over every forward call).
        w = weight.T.astype(compute_dtype)        # (K, N): native MXU layout
        if (self.Kp, self.Np) != (K, N):
            w = jnp.pad(w, ((0, self.Kp - K), (0, self.Np - N)))
        self.w_kn = jax.device_put(w)

        if bias is None:
            self.b_1n = None
        else:
            b = jnp.asarray(bias).astype(jnp.float32).reshape(1, N)
            if self.Np != N:
                b = jnp.pad(b, ((0, 0), (0, self.Np - N)))
            self.b_1n = jax.device_put(b)

    def __call__(self, x, y):
        return _linear_add_fwd(
            x, y, self.w_kn, self.b_1n,
            in_features=self.in_features, out_features=self.out_features,
            tm=self.tm, tn_e=self.tn_e, tk_e=self.tk_e,
            Np=self.Np, Kp=self.Kp,
            compute_dtype=self.compute_dtype,
            has_bias=self.b_1n is not None)


# TODO(synk): IPEX's device-dispatch machinery (init_on_device /
# IPEXRuntimeCustomOps) is runtime plumbing, not math; only the fused forward
# (linear(x) + other) is implemented here.

if __name__ == "__main__":
    in_features, out_features = 256, 128
    batch, seq = 2, 8

    key = jax.random.PRNGKey(0)
    kx, kw, kb, ky = jax.random.split(key, 4)

    x = jax.random.normal(kx, (batch, seq, in_features), dtype=jnp.float32)
    # torch.nn.Linear convention: weight is (out_features, in_features).
    weight = jax.random.normal(kw, (out_features, in_features), jnp.float32) * 0.05
    bias = jax.random.normal(kb, (out_features,), jnp.float32) * 0.05
    other = jax.random.normal(ky, (batch, seq, out_features), jnp.float32)

    # Reference (plain JAX, f32): LinearAdd forward = linear(x) + other.
    ref = x @ weight.T + bias + other

    # Default mixed-precision path (bf16 MXU inputs, f32 accumulation).
    fused = LinearAddTPU(weight, bias)
    out = jax.block_until_ready(fused(x, other))
    assert out.shape == (batch, seq, out_features)
    assert jnp.allclose(out, ref, atol=2e-2, rtol=2e-2)

    # Exact f32 path (single-K fast kernel).
    fused_f32 = LinearAddTPU(weight, bias, compute_dtype=jnp.float32)
    out_f32 = jax.block_until_ready(fused_f32(x, other))
    assert jnp.allclose(out_f32, ref, atol=1e-4, rtol=1e-4)

    # Exercise the K-reduction kernel (kt > 1) as well.
    fused_red = LinearAddTPU(weight, bias, tk=128, compute_dtype=jnp.float32)
    out_red = jax.block_until_ready(fused_red(x, other))
    assert jnp.allclose(out_red, ref, atol=1e-4, rtol=1e-4)

    # No-bias variant (static kernel without the bias DMA/add).
    fused_nb = LinearAddTPU(weight, None, compute_dtype=jnp.float32)
    ref_nb = x @ weight.T + other
    out_nb = jax.block_until_ready(fused_nb(x, other))
    assert jnp.allclose(out_nb, ref_nb, atol=1e-4, rtol=1e-4)

    print("KERNEL_OK")
</pallas_src>

<mosaic_0001>
module attributes {stable_mosaic.version = 11 : i64} {
  func.func @_kernel_1k_bias(%arg0: i32, %arg1: i32, %arg2: memref<128x256xbf16, #tpu.memory_space<vmem>>, %arg3: memref<256x128xbf16, #tpu.memory_space<vmem>>, %arg4: memref<1x128xf32, #tpu.memory_space<vmem>>, %arg5: memref<128x128xf32, #tpu.memory_space<vmem>>, %arg6: memref<128x128xf32, #tpu.memory_space<vmem>>) attributes {dimension_semantics = [#tpu.dimension_semantics<parallel>, #tpu.dimension_semantics<parallel>], iteration_bounds = array<i64: 1, 1>, scalar_prefetch = 0 : i64, scratch_operands = 0 : i64, tpu.core_type = #tpu.core_type<tc>, window_params = [{transform_indices = @transform_0, window_bounds = array<i64: 128, 256>}, {transform_indices = @transform_1, window_bounds = array<i64: 256, 128>}, {transform_indices = @transform_2, window_bounds = array<i64: 1, 128>}, {transform_indices = @transform_3, window_bounds = array<i64: 128, 128>}, {transform_indices = @transform_4, window_bounds = array<i64: 128, 128>}]} {
    %c0 = arith.constant 0 : index
    %c0_0 = arith.constant 0 : index
    %0 = vector.load %arg2[%c0, %c0_0] : memref<128x256xbf16, #tpu.memory_space<vmem>>, vector<128x256xbf16>
    %c0_1 = arith.constant 0 : index
    %c0_2 = arith.constant 0 : index
    %1 = vector.load %arg3[%c0_1, %c0_2] : memref<256x128xbf16, #tpu.memory_space<vmem>>, vector<256x128xbf16>
    %cst = arith.constant dense<0.000000e+00> : vector<128x128xf32>
    %2 = tpu.matmul %0, %1, %cst {dimension_numbers = #tpu.dot_dimension_numbers<[1], [0], [0], [1], [0, 0, 1, 1], [], []>} : vector<128x256xbf16>, vector<256x128xbf16>, vector<128x128xf32> -> vector<128x128xf32>
    %c0_3 = arith.constant 0 : index
    %c0_4 = arith.constant 0 : index
    %3 = vector.load %arg4[%c0_3, %c0_4] : memref<1x128xf32, #tpu.memory_space<vmem>>, vector<1x128xf32>
    %4 = vector.broadcast %3 : vector<1x128xf32> to vector<128x128xf32>
    %5 = arith.addf %2, %4 : vector<128x128xf32>
    %c0_5 = arith.constant 0 : index
    %c0_6 = arith.constant 0 : index
    %6 = vector.load %arg5[%c0_5, %c0_6] : memref<128x128xf32, #tpu.memory_space<vmem>>, vector<128x128xf32>
    %7 = arith.addf %5, %6 : vector<128x128xf32>
    %c0_7 = arith.constant 0 : index
    %c0_8 = arith.constant 0 : index
    %8 = vector.load %arg6[%c0_7, %c0_8] : memref<128x128xf32, #tpu.memory_space<vmem>>, vector<128x128xf32>
    tpu.vector_store %arg6[%c0_7, %c0_8], %7 {strides = array<i32>} : memref<128x128xf32, #tpu.memory_space<vmem>>, vector<128x128xf32>,
    return
  }
  func.func @transform_0(%arg0: i32, %arg1: i32) -> (i32, i32) {
    %c0_i32 = arith.constant 0 : i32
    %c0_i32_0 = arith.constant 0 : i32
    return %arg0, %c0_i32 : i32, i32
  }
  func.func @transform_1(%arg0: i32, %arg1: i32) -> (i32, i32) {
    %c0_i32 = arith.constant 0 : i32
    %c0_i32_0 = arith.constant 0 : i32
    return %c0_i32, %arg1 : i32, i32
  }
  func.func @transform_2(%arg0: i32, %arg1: i32) -> (i32, i32) {
    %c0_i32 = arith.constant 0 : i32
    %c0_i32_0 = arith.constant 0 : i32
    return %c0_i32, %arg1 : i32, i32
  }
  func.func @transform_3(%arg0: i32, %arg1: i32) -> (i32, i32) {
    %c0_i32 = arith.constant 0 : i32
    return %arg0, %arg1 : i32, i32
  }
  func.func @transform_4(%arg0: i32, %arg1: i32) -> (i32, i32) {
    %c0_i32 = arith.constant 0 : i32
    return %arg0, %arg1 : i32, i32
  }
}

</mosaic_0001>

<bundles_post_ra>
// kernel: _linear_add_fwd.1
= control target key start
LH: loop header
LB: loop body
LE: loop exit
PB: predicated region body
PF: predicated region fallthrough
CT: control target
= control target key end

     0   :  { %s789_s1 = inlined_call_operand.vmem [shape: bf16[256,128], index: 1, kind: input, shape index: {}]   ;;  %s790_s0 = inlined_call_operand.vmem [shape: bf16[128,256], index: 0, kind: input, shape index: {}]   ;;  %s791_s2 = inlined_call_operand.vmem [shape: f32[1,128], index: 2, kind: input, shape index: {}]   ;;  %s792_s3 = inlined_call_operand.vmem [shape: f32[128,128], index: 3, kind: input, shape index: {}, may-alias: {3,4}]   ;;  %s793_s4 = inlined_call_operand.vmem [shape: f32[128,128], index: 4, kind: output, shape index: {}, may-alias: {3,4}]  }
   0x1   :  { %v511_v0 = vld [vmem:[%s789_s1 + $0x40] sm:$0xff]   ;;  %v513_v2 = vld [vmem:[%s789_s1 + $0x48] sm:$0xff]   ;;  %v515_v4 = vld [vmem:[%s789_s1 + $0x50] sm:$0xff]  }
   0x2   :  { %v512_v1 = vld [vmem:[%s789_s1] sm:$0xff]   ;;  %431 = vmatprep.subr.bf16.mxu0 %v511_v0  ;;  %495 = vmatprep.subr.bf16.mxu1 %v511_v0  ;;  %v514_v3 = vld [vmem:[%s789_s1 + $0x8] sm:$0xff]   ;;  %v516_v5 = vld [vmem:[%s789_s1 + $0x10] sm:$0xff]  }
   0x3   :  { %432 = vmatpush3.bf16.msra.mxu0 %v512_v1  ;;  %503 = vmatpush3.bf16.msra.mxu1 %v512_v1  ;;  %v517_v6 = vld [vmem:[%s789_s1 + $0x58] sm:$0xff]   ;;  %v519_v8 = vld [vmem:[%s789_s1 + $0x60] sm:$0xff]   ;;  %v521_v10 = vld [vmem:[%s789_s1 + $0x68] sm:$0xff]  }
   0x4   :  { %433 = vmatprep.subr.bf16.mxu0 %v513_v2  ;;  %496 = vmatprep.subr.bf16.mxu1 %v513_v2  ;;  %v518_v7 = vld [vmem:[%s789_s1 + $0x18] sm:$0xff]   ;;  %v520_v9 = vld [vmem:[%s789_s1 + $0x20] sm:$0xff]   ;;  %v522_v13 = vld [vmem:[%s789_s1 + $0x28] sm:$0xff]  }
   0x5   :  { %v529_v11 = vld [vmem:[%s790_s0 + $0x4] ss:$8 sps:$4 sm:$0xff]   ;;  %v523_v14 = vld [vmem:[%s789_s1 + $0x70] sm:$0xff]   ;;  %v525_v16 = vld [vmem:[%s789_s1 + $0x78] sm:$0xff]  }
   0x6   :  { %v532_v12 = vld [vmem:[%s790_s0 + $0x44] ss:$8 sps:$4 sm:$0xff]   ;;  %281 = vmatprep.mubr.bf16.mxu0 %v529_v11  ;;  %v524_v15 = vld [vmem:[%s789_s1 + $0x30] sm:$0xff]   ;;  %v526_v17 = vld [vmem:[%s789_s1 + $0x38] sm:$0xff]  }
   0x7   :  { %434 = vmatpush3.bf16.msra.mxu0 %v514_v3  ;;  %504 = vmatpush3.bf16.msra.mxu1 %v514_v3  ;;  %v527_v18 = vld [vmem:[%s790_s0] ss:$8 sps:$4 sm:$0xff]   ;;  %v533_v20 = vld [vmem:[%s790_s0 + $0x14] ss:$8 sps:$4 sm:$0xff]   ;;  %v537_v22 = vld [vmem:[%s790_s0 + $0x10] ss:$8 sps:$4 sm:$0xff]  }
   0x8   :  { %435 = vmatprep.subr.bf16.mxu0 %v515_v4  ;;  %497 = vmatprep.subr.bf16.mxu1 %v515_v4  ;;  %v530_v19 = vld [vmem:[%s790_s0 + $0x40] ss:$8 sps:$4 sm:$0xff]   ;;  %v535_v21 = vld [vmem:[%s790_s0 + $0x54] ss:$8 sps:$4 sm:$0xff]   ;;  %v538_v23 = vld [vmem:[%s790_s0 + $0x50] ss:$8 sps:$4 sm:$0xff]  }
   0x9   :  { %313 = vmatprep.mubr.bf16.mxu1 %v532_v12  ;;  %v539_v24 = vld [vmem:[%s790_s0 + $0x24] ss:$8 sps:$4 sm:$0xff]   ;;  %v543_v26 = vld [vmem:[%s790_s0 + $0x20] ss:$8 sps:$4 sm:$0xff]   ;;  %v545_v28 = vld [vmem:[%s790_s0 + $0x34] ss:$8 sps:$4 sm:$0xff]  }
   0xa   :  { %v541_v25 = vld [vmem:[%s790_s0 + $0x64] ss:$8 sps:$4 sm:$0xff]   ;;  %v544_v27 = vld [vmem:[%s790_s0 + $0x60] ss:$8 sps:$4 sm:$0xff]   ;;  %v547_v29 = vld [vmem:[%s790_s0 + $0x74] ss:$8 sps:$4 sm:$0xff]  }
   0xb   :  { %436 = vmatpush3.bf16.msra.mxu0 %v516_v5  ;;  %505 = vmatpush3.bf16.msra.mxu1 %v516_v5  ;;  %v549_v30 = vld [vmem:[%s790_s0 + $0x30] ss:$8 sps:$4 sm:$0xff]   ;;  %v675_v34 = vld [vmem:[%s791_s2] ss:$0 sm:$0xff]  ;;  %v347_v49 = vld [vmem:[%s792_s3 + $0x8] sm:$0xff] }
   0xc   :  { %437 = vmatprep.subr.bf16.mxu0 %v517_v6  ;;  %498 = vmatprep.subr.bf16.mxu1 %v517_v6  ;;  %v550_v31 = vld [vmem:[%s790_s0 + $0x70] ss:$8 sps:$4 sm:$0xff]   ;;  %v346_v41 = vld [vmem:[%s792_s3] sm:$0xff]  ;;  %v355_v50 = vld [vmem:[%s792_s3 + $0x48] sm:$0xff] }
   0xd   :  { %v354_v42 = vld [vmem:[%s792_s3 + $0x40] sm:$0xff] }
   0xf   :  { %438 = vmatpush3.bf16.msra.mxu0 %v518_v7  ;;  %506 = vmatpush3.bf16.msra.mxu1 %v518_v7 }
  0x10   :  { %439 = vmatprep.subr.bf16.mxu0 %v519_v8  ;;  %499 = vmatprep.subr.bf16.mxu1 %v519_v8 }
  0x13   :  { %440 = vmatpush3.bf16.msra.mxu0 %v520_v9  ;;  %507 = vmatpush3.bf16.msra.mxu1 %v520_v9 }
  0x14   :  { %441 = vmatprep.subr.bf16.mxu0 %v521_v10  ;;  %500 = vmatprep.subr.bf16.mxu1 %v521_v10 }
  0x17   :  { %442 = vmatpush3.bf16.msra.mxu0 %v522_v13  ;;  %508 = vmatpush3.bf16.msra.mxu1 %v522_v13 }
  0x18   :  { %443 = vmatprep.subr.bf16.mxu0 %v523_v14  ;;  %501 = vmatprep.subr.bf16.mxu1 %v523_v14 }
  0x1b   :  { %444 = vmatpush3.bf16.msra.mxu0 %v524_v15  ;;  %509 = vmatpush3.bf16.msra.mxu1 %v524_v15 }
  0x1c   :  { %445 = vmatprep.subr.bf16.mxu0 %v525_v16  ;;  %502 = vmatprep.subr.bf16.mxu1 %v525_v16 }
  0x1f   :  { %446 = vmatpush3.bf16.msra.mxu0 %v526_v17  ;;  %510 = vmatpush3.bf16.msra.mxu1 %v526_v17 }
  0x22   :  { %282 = vmatmul.mubr.bf16.vlgmr.msra.gmra.mrb[0].mxu0 %v527_v18  ;;  %314 = vmatmul.mubr.bf16.vlgmr.msra.gmra.mrb[0].mxu1 %v530_v19 }
  0x23   :  { %289 = vmatprep.mubr.bf16.mxu0 %v533_v20  ;;  %321 = vmatprep.mubr.bf16.mxu1 %v535_v21 }
  0x2a   :  { %290 = vmatmul.mubr.bf16.gmra.mrb[4].mxu0 %v537_v22  ;;  %322 = vmatmul.mubr.bf16.gmra.mrb[4].mxu1 %v538_v23 }
  0x2b   :  { %297 = vmatprep.mubr.bf16.mxu0 %v539_v24  ;;  %329 = vmatprep.mubr.bf16.mxu1 %v541_v25 }
  0x32   :  { %298 = vmatmul.mubr.bf16.gmra.mrb[8].mxu0 %v543_v26  ;;  %330 = vmatmul.mubr.bf16.gmra.mrb[8].mxu1 %v544_v27 }
  0x33   :  { %305 = vmatprep.mubr.bf16.mxu0 %v545_v28  ;;  %337 = vmatprep.mubr.bf16.mxu1 %v547_v29 }
  0x3a   :  { %306 = vmatmul.mubr.bf16.gmra.mrb[12].mxu0 %v549_v30  ;;  %338 = vmatmul.mubr.bf16.gmra.mrb[12].mxu1 %v550_v31 }
  0xf5   :  { %v447_v32 = vpop.f32.mrb[0].mxu0  ;;  %v471_v33 = vpop.f32.mrb[0].mxu1 }
  0xf6   :  { %v448_v35 = vpop.f32.mrb[1].mxu0  ;;  %v472_v36 = vpop.f32.mrb[1].mxu1 }
  0xf7   :  { %v449_v37 = vadd.f32 %v448_v35, %v447_v32  ;;  %v473_v38 = vadd.f32 %v472_v36, %v471_v33  ;;  %v450_v39 = vpop.f32.mrb[2].mxu0  ;;  %v474_v40 = vpop.f32.mrb[2].mxu1 }
  0xf8   :  { %v451_v43 = vpop.f32.mrb[3].mxu0  ;;  %v475_v44 = vpop.f32.mrb[3].mxu1 }
  0xf9   :  { %v284_v45 = vadd.f32 %v449_v37, %v675_v34  ;;  %v316_v46 = vadd.f32 %v473_v38, %v675_v34  ;;  %v452_v47 = vadd.f32 %v451_v43, %v450_v39  ;;  %v476_v48 = vadd.f32 %v475_v44, %v474_v40 }
  0xfb   :  { %v362_v51 = vadd.f32 %v346_v41, %v284_v45  ;;  %v370_v52 = vadd.f32 %v354_v42, %v316_v46  ;;  %v287_v53 = vadd.f32 %v452_v47, %v675_v34  ;;  %v319_v54 = vadd.f32 %v476_v48, %v675_v34 }
  0xfd   :  { %378 = vst [vmem:[%s793_s4] sm:$0xff] %v362_v51  ;;  %386 = vst [vmem:[%s793_s4 + $0x40] sm:$0xff] %v370_v52  ;;  %v363_v55 = vadd.f32 %v347_v49, %v287_v53  ;;  %v371_v56 = vadd.f32 %v355_v50, %v319_v54  ;;  %v453_v57 = vpop.f32.mrb[4].mxu0  ;;  %v477_v58 = vpop.f32.mrb[4].mxu1 }
  0xfe   :  { %v454_v59 = vpop.f32.mrb[5].mxu0  ;;  %v478_v60 = vpop.f32.mrb[5].mxu1 }
  0xff   :  { %379 = vst [vmem:[%s793_s4 + $0x8] sm:$0xff] %v363_v55  ;;  %387 = vst [vmem:[%s793_s4 + $0x48] sm:$0xff] %v371_v56  ;;  %v455_v61 = vadd.f32 %v454_v59, %v453_v57  ;;  %v479_v62 = vadd.f32 %v478_v60, %v477_v58  ;;  %v456_v63 = vpop.f32.mrb[6].mxu0  ;;  %v480_v0 = vpop.f32.mrb[6].mxu1 }
 0x100   :  { %v457_v3 = vpop.f32.mrb[7].mxu0  ;;  %v481_v4 = vpop.f32.mrb[7].mxu1 }
 0x101   :  { %v292_v5 = vadd.f32 %v455_v61, %v675_v34  ;;  %v324_v6 = vadd.f32 %v479_v62, %v675_v34  ;;  %v458_v7 = vadd.f32 %v457_v3, %v456_v63  ;;  %v482_v8 = vadd.f32 %v481_v4, %v480_v0 }
 0x103   :  { %v295_v13 = vadd.f32 %v458_v7, %v675_v34  ;;  %v327_v14 = vadd.f32 %v482_v8, %v675_v34 }
 0x105   :  { %v459_v17 = vpop.f32.mrb[8].mxu0  ;;  %v483_v18 = vpop.f32.mrb[8].mxu1 }
 0x106   :  { %v348_v1 = vld [vmem:[%s792_s3 + $0x10] sm:$0xff]  ;;  %v349_v9 = vld [vmem:[%s792_s3 + $0x18] sm:$0xff]  ;;  %v460_v19 = vpop.f32.mrb[9].mxu0  ;;  %v484_v20 = vpop.f32.mrb[9].mxu1 }
 0x107   :  { %v356_v2 = vld [vmem:[%s792_s3 + $0x50] sm:$0xff]  ;;  %v357_v10 = vld [vmem:[%s792_s3 + $0x58] sm:$0xff]  ;;  %v364_v11 = vadd.f32 %v348_v1, %v292_v5  ;;  %v365_v15 = vadd.f32 %v349_v9, %v295_v13  ;;  %v461_v21 = vadd.f32 %v460_v19, %v459_v17  ;;  %v485_v22 = vadd.f32 %v484_v20, %v483_v18  ;;  %v462_v23 = vpop.f32.mrb[10].mxu0  ;;  %v486_v24 = vpop.f32.mrb[10].mxu1 }
 0x108   :  { %v372_v12 = vadd.f32 %v356_v2, %v324_v6  ;;  %v373_v16 = vadd.f32 %v357_v10, %v327_v14  ;;  %v463_v27 = vpop.f32.mrb[11].mxu0  ;;  %v487_v28 = vpop.f32.mrb[11].mxu1 }
 0x109   :  { %380 = vst [vmem:[%s793_s4 + $0x10] sm:$0xff] %v364_v11  ;;  %381 = vst [vmem:[%s793_s4 + $0x18] sm:$0xff] %v365_v15  ;;  %v300_v29 = vadd.f32 %v461_v21, %v675_v34  ;;  %v332_v30 = vadd.f32 %v485_v22, %v675_v34  ;;  %v464_v31 = vadd.f32 %v463_v27, %v462_v23 }
 0x10a   :  { %388 = vst [vmem:[%s793_s4 + $0x50] sm:$0xff] %v372_v12  ;;  %389 = vst [vmem:[%s793_s4 + $0x58] sm:$0xff] %v373_v16  ;;  %v488_v32 = vadd.f32 %v487_v28, %v486_v24 }
 0x10b   :  { %v303_v38 = vadd.f32 %v464_v31, %v675_v34 }
 0x10c   :  { %v335_v39 = vadd.f32 %v488_v32, %v675_v34 }
 0x10d   :  { %v465_v42 = vpop.f32.mrb[12].mxu0  ;;  %v489_v43 = vpop.f32.mrb[12].mxu1 }
 0x10e   :  { %v466_v44 = vpop.f32.mrb[13].mxu0  ;;  %v490_v45 = vpop.f32.mrb[13].mxu1 }
 0x10f   :  { %v467_v46 = vadd.f32 %v466_v44, %v465_v42  ;;  %v491_v47 = vadd.f32 %v490_v45, %v489_v43  ;;  %v468_v48 = vpop.f32.mrb[14].mxu0  ;;  %v492_v49 = vpop.f32.mrb[14].mxu1 }
 0x110   :  { %v469_v52 = vpop.f32.mrb[15].mxu0  ;;  %v493_v53 = vpop.f32.mrb[15].mxu1 }
 0x111   :  { %v350_v25 = vld [vmem:[%s792_s3 + $0x20] sm:$0xff]  ;;  %v351_v33 = vld [vmem:[%s792_s3 + $0x28] sm:$0xff]  ;;  %v308_v54 = vadd.f32 %v467_v46, %v675_v34  ;;  %v340_v55 = vadd.f32 %v491_v47, %v675_v34  ;;  %v470_v56 = vadd.f32 %v469_v52, %v468_v48  ;;  %v494_v57 = vadd.f32 %v493_v53, %v492_v49 }
 0x112   :  { %v358_v26 = vld [vmem:[%s792_s3 + $0x60] sm:$0xff]  ;;  %v359_v35 = vld [vmem:[%s792_s3 + $0x68] sm:$0xff]  ;;  %v366_v36 = vadd.f32 %v350_v25, %v300_v29  ;;  %v367_v40 = vadd.f32 %v351_v33, %v303_v38 }
 0x113   :  { %v374_v37 = vadd.f32 %v358_v26, %v332_v30  ;;  %v375_v41 = vadd.f32 %v359_v35, %v335_v39  ;;  %v311_v62 = vadd.f32 %v470_v56, %v675_v34  ;;  %v343_v63 = vadd.f32 %v494_v57, %v675_v34 }
 0x114   :  { %382 = vst [vmem:[%s793_s4 + $0x20] sm:$0xff] %v366_v36  ;;  %383 = vst [vmem:[%s793_s4 + $0x28] sm:$0xff] %v367_v40 }
 0x115   :  { %390 = vst [vmem:[%s793_s4 + $0x60] sm:$0xff] %v374_v37  ;;  %391 = vst [vmem:[%s793_s4 + $0x68] sm:$0xff] %v375_v41 }
 0x11c   :  { %v352_v50 = vld [vmem:[%s792_s3 + $0x30] sm:$0xff]  ;;  %v353_v58 = vld [vmem:[%s792_s3 + $0x38] sm:$0xff] }
 0x11d   :  { %v360_v51 = vld [vmem:[%s792_s3 + $0x70] sm:$0xff]  ;;  %v361_v59 = vld [vmem:[%s792_s3 + $0x78] sm:$0xff]  ;;  %v368_v60 = vadd.f32 %v352_v50, %v308_v54  ;;  %v369_v0 = vadd.f32 %v353_v58, %v311_v62 }
 0x11e   :  { %v376_v61 = vadd.f32 %v360_v51, %v340_v55  ;;  %v377_v1 = vadd.f32 %v361_v59, %v343_v63 }
 0x11f   :  { %384 = vst [vmem:[%s793_s4 + $0x30] sm:$0xff] %v368_v60  ;;  %385 = vst [vmem:[%s793_s4 + $0x38] sm:$0xff] %v369_v0 }
 0x120   :  { %392 = vst [vmem:[%s793_s4 + $0x70] sm:$0xff] %v376_v61  ;;  %393 = vst [vmem:[%s793_s4 + $0x78] sm:$0xff] %v377_v1 }

</bundles_post_ra>
